<compile_context>
chip_gen: v7x
topology: tpu7x:2x2x1
jax: 0.10.0
libtpu: 0.0.40
codegen_flags: <defaults>
</compile_context>

<pallas_src>
import functools
import math

import jax
import jax.numpy as jnp
from jax.experimental import pallas as pl
from jax.experimental.pallas import tpu as pltpu

LANES = 128
_CORE_SPLIT = 2        # leading "parallel" grid axis (2 TCs on v7x; serial elsewhere)
_MSE_TILE_ROWS = 2048  # 1 MiB f32 per input tile; 2 inputs double-buffered ~4 MiB
_BPP_TILE_ROWS = 2048  # 1 MiB f32 tile; amortizes per-step overhead


def _round_up(n, m):
    return ((n + m - 1) // m) * m


# ------------------------------------------------------------------ kernels

def _mse_partial_kernel(x_ref, xh_ref, out_ref, acc_ref, *,
                        steps_per_core, tile_rows, rows_data, needs_mask):
    """Accumulate (x - x_hat)^2 element-wise into a VMEM-resident f32 acc;
    write a single sublane-reduced (1, 128) slab on this core's last step."""
    i = pl.program_id(1)

    @pl.when(i == 0)
    def _():
        acc_ref[...] = jnp.zeros_like(acc_ref)

    d = x_ref[...].astype(jnp.float32) - xh_ref[...].astype(jnp.float32)
    d2 = d * d
    if needs_mask:
        # Static Python gate: only traced when the grid does not exactly tile
        # the data.  Rows at or past `rows_data` are either unspecified data of
        # a partial last block or belong to a clamped phantom step -> zero them.
        gstep = pl.program_id(0) * steps_per_core + i
        row = jax.lax.broadcasted_iota(jnp.int32, d2.shape, 0)
        d2 = jnp.where(gstep * tile_rows + row < rows_data, d2, 0.0)
    acc_ref[...] += d2          # pure VALU; no XLU / masked scalar stores per step

    @pl.when(i == steps_per_core - 1)
    def _():
        # One-time sublane reduce (XLU slot otherwise idle); only (1,128)
        # lane-dense f32 ever hits HBM.
        out_ref[...] = jnp.sum(acc_ref[...], axis=0, keepdims=True)


def _bpp_partial_kernel(lik_ref, out_ref, acc_ref, *,
                        steps_per_core, tile_rows, rows_data, needs_mask):
    """Accumulate log(likelihoods) element-wise (per batch, per core)."""
    i = pl.program_id(2)

    @pl.when(i == 0)
    def _():
        acc_ref[...] = jnp.zeros_like(acc_ref)

    ll = jnp.log(lik_ref[...].astype(jnp.float32))   # log -> EUP slot
    if needs_mask:
        gstep = pl.program_id(0) * steps_per_core + i
        row = jax.lax.broadcasted_iota(jnp.int32, ll.shape, 0)
        ll = jnp.where(gstep * tile_rows + row < rows_data, ll, 0.0)
    acc_ref[...] += ll

    @pl.when(i == steps_per_core - 1)
    def _():
        out_ref[...] = jnp.sum(acc_ref[...], axis=0, keepdims=True)


# ------------------------------------------------------------------ layout

def _reduction_layout(rows_data, target_tile_rows):
    """Pick (tile_rows, nb, core_split, steps_per_core, needs_mask)."""
    target = _round_up(max(int(target_tile_rows), 8), 8)
    # Small inputs: one full-extent block (legal for any dtype, no masking).
    tile_rows = rows_data if rows_data <= target else target
    nb = pl.cdiv(rows_data, tile_rows)                 # number of real blocks
    core_split = _CORE_SPLIT if nb >= _CORE_SPLIT else 1
    steps_per_core = pl.cdiv(nb, core_split)
    needs_mask = (core_split * steps_per_core * tile_rows != rows_data)
    return tile_rows, nb, core_split, steps_per_core, needs_mask


# ------------------------------------------------------------------ wrappers

def _mse_sq_sum(x, x_hat, *, target_tile_rows=_MSE_TILE_ROWS):
    """sum((x - x_hat)^2) over all elements, accumulated in f32."""
    numel = x.size
    xf = x.reshape(-1)
    xhf = x_hat.reshape(-1)
    pad = (-numel) % LANES                      # Python int (static)
    if pad:
        # Rare slow path: full copy only when numel is not a multiple of 128.
        xf = jnp.pad(xf, (0, pad))              # zero pad -> diff == 0
        xhf = jnp.pad(xhf, (0, pad))
    rows_data = (numel + pad) // LANES
    xf = xf.reshape(rows_data, LANES)
    xhf = xhf.reshape(rows_data, LANES)

    tile_rows, nb, core_split, steps_per_core, needs_mask = _reduction_layout(
        rows_data, target_tile_rows)

    # Clamp so phantom steps (core_split not dividing nb) re-read the last
    # valid block instead of DMA-ing out of bounds; the in-kernel row mask
    # zeroes their contribution.
    in_map = lambda c, i: (jnp.minimum(c * steps_per_core + i, nb - 1), 0)

    kernel = functools.partial(
        _mse_partial_kernel, steps_per_core=steps_per_core,
        tile_rows=tile_rows, rows_data=rows_data, needs_mask=needs_mask)

    partials = pl.pallas_call(
        kernel,
        out_shape=jax.ShapeDtypeStruct((core_split, 1, LANES), jnp.float32),
        grid_spec=pltpu.PrefetchScalarGridSpec(
            num_scalar_prefetch=0,
            grid=(core_split, steps_per_core),
            in_specs=[
                pl.BlockSpec((tile_rows, LANES), in_map),
                pl.BlockSpec((tile_rows, LANES), in_map),
            ],
            out_specs=pl.BlockSpec((None, 1, LANES), lambda c, i: (c, 0, 0)),
            scratch_shapes=[pltpu.VMEM((tile_rows, LANES), jnp.float32)],
        ),
        compiler_params=pltpu.CompilerParams(
            dimension_semantics=("parallel", "arbitrary")),
    )(xf, xhf)
    return jnp.sum(partials)


def _bpp_per_batch_sums(likelihoods, *, target_tile_rows=_BPP_TILE_ROWS):
    """s[b] = sum(log(likelihoods[b])) over all non-batch dims, as (B,) f32."""
    B = likelihoods.shape[0]
    per_batch = likelihoods.reshape(B, -1)
    n = per_batch.shape[1]
    pad = (-n) % LANES                          # Python int (static)
    if pad:
        # Rare slow path: pad with 1.0 so log(1) == 0 contributes nothing.
        per_batch = jnp.pad(per_batch, ((0, 0), (0, pad)), constant_values=1)
    rows_data = (n + pad) // LANES
    lik = per_batch.reshape(B, rows_data, LANES)

    tile_rows, nb, core_split, steps_per_core, needs_mask = _reduction_layout(
        rows_data, target_tile_rows)

    in_map = lambda c, b, i: (b, jnp.minimum(c * steps_per_core + i, nb - 1), 0)

    kernel = functools.partial(
        _bpp_partial_kernel, steps_per_core=steps_per_core,
        tile_rows=tile_rows, rows_data=rows_data, needs_mask=needs_mask)

    partials = pl.pallas_call(
        kernel,
        out_shape=jax.ShapeDtypeStruct((core_split, B, 1, LANES), jnp.float32),
        grid_spec=pltpu.PrefetchScalarGridSpec(
            num_scalar_prefetch=0,
            grid=(core_split, B, steps_per_core),
            in_specs=[pl.BlockSpec((None, tile_rows, LANES), in_map)],
            out_specs=pl.BlockSpec((None, None, 1, LANES),
                                   lambda c, b, i: (c, b, 0, 0)),
            scratch_shapes=[pltpu.VMEM((tile_rows, LANES), jnp.float32)],
        ),
        compiler_params=pltpu.CompilerParams(
            dimension_semantics=("parallel", "parallel", "arbitrary")),
    )(lik)
    return jnp.sum(partials, axis=(0, 2, 3))    # (B,)


def rate_distortion_loss_ql(data, output, *, std, coff, lmbda=0.01,
                            mse_tile_rows=_MSE_TILE_ROWS,
                            bpp_tile_rows=_BPP_TILE_ROWS):
    """Mirrors RateDistortionLoss_ql.forward (likelihoods is a single tensor,
    batch-major, exactly as in the reference module)."""
    x = output["x"]
    x_hat = output["x_hat"]
    likelihoods = output["likelihoods"]
    q_level = data["q_level"]

    num_pixels = x.size

    sq_sum = _mse_sq_sum(x, x_hat, target_tile_rows=mse_tile_rows)
    recon_loss = (sq_sum / num_pixels) / (std ** 2)

    # Per-batch log-likelihood sums come from the kernel; the coff gather and
    # the (un)weighted combines are scalar-sized JAX glue.
    s_per_batch = _bpp_per_batch_sums(likelihoods, target_tile_rows=bpp_tile_rows)
    coff_per_batch = jnp.take(jnp.asarray(coff), q_level).astype(jnp.float32)

    denom = -math.log(2) * num_pixels
    bpp_loss = jnp.sum(s_per_batch) / denom
    weighted_bpp_loss = jnp.dot(s_per_batch, coff_per_batch) / denom

    loss = lmbda * recon_loss + weighted_bpp_loss
    return {"recon_loss": recon_loss, "bpp_loss": bpp_loss, "loss": loss}


# ------------------------------------------------------------------ reference

def _reference(data, output, *, std, coff, lmbda):
    x = output["x"].astype(jnp.float32)
    x_hat = output["x_hat"].astype(jnp.float32)
    lik = output["likelihoods"].astype(jnp.float32)
    q_level = data["q_level"]
    num_pixels = x.size
    recon = jnp.mean((x - x_hat) ** 2) / (std ** 2)
    log_lik = jnp.log(lik)
    bpp = jnp.sum(log_lik) / (-math.log(2) * num_pixels)
    c = jnp.take(jnp.asarray(coff, jnp.float32), q_level).reshape(
        (lik.shape[0],) + (1,) * (lik.ndim - 1))
    w = jnp.sum(log_lik * c) / (-math.log(2) * num_pixels)
    return {"recon_loss": recon, "bpp_loss": bpp, "loss": lmbda * recon + w}


def _check(got, ref, rtol, atol):
    for k in ("recon_loss", "bpp_loss", "loss"):
        assert jnp.allclose(got[k], ref[k], rtol=rtol, atol=atol), \
            (k, float(got[k]), float(ref[k]))


# ------------------------------------------------------------------ main

if __name__ == "__main__":
    key = jax.random.PRNGKey(0)
    k1, k2, k3, k4, k5, k6 = jax.random.split(key, 6)

    std = 1.5
    lmbda = 0.01
    NQ = 8
    coff = jnp.linspace(0.5, 2.0, NQ, dtype=jnp.float32)

    # Case 1: small lane-aligned shapes (fast path: no pad, single full block).
    B, C, H, W = 2, 4, 16, 16
    x = jax.random.normal(k1, (B, C, H, W), dtype=jnp.float32)
    x_hat = x + 0.1 * jax.random.normal(k2, (B, C, H, W), dtype=jnp.float32)
    likelihoods = jax.random.uniform(k3, (B, 8, 128), dtype=jnp.float32,
                                     minval=0.05, maxval=1.0)
    q_level = jnp.array([1, 3], dtype=jnp.int32)
    data1 = {"q_level": q_level}
    out1 = {"x": x, "x_hat": x_hat, "likelihoods": likelihoods}

    got1 = rate_distortion_loss_ql(data1, out1, std=std, coff=coff, lmbda=lmbda)
    jax.block_until_ready(got1["loss"])
    _check(got1, _reference(data1, out1, std=std, coff=coff, lmbda=lmbda),
           rtol=1e-5, atol=1e-6)

    # Case 2: ragged shapes with tiny tile targets, exercising the flat-pad,
    # partial-block mask, phantom-step clamp and 2-way core-split code paths.
    x2 = jax.random.normal(k4, (3, 3, 20, 24), dtype=jnp.float32)       # 4320 elems
    x2_hat = x2 + 0.05 * jax.random.normal(k5, (3, 3, 20, 24), dtype=jnp.float32)
    lik2 = jax.random.uniform(k6, (3, 50, 50), dtype=jnp.float32,
                              minval=0.05, maxval=1.0)                  # 2500/batch
    q2 = jnp.array([0, 2, 5], dtype=jnp.int32)
    data2 = {"q_level": q2}
    out2 = {"x": x2, "x_hat": x2_hat, "likelihoods": lik2}

    got2 = rate_distortion_loss_ql(data2, out2, std=std, coff=coff, lmbda=lmbda,
                                   mse_tile_rows=8, bpp_tile_rows=8)
    jax.block_until_ready(got2["loss"])
    _check(got2, _reference(data2, out2, std=std, coff=coff, lmbda=lmbda),
           rtol=1e-5, atol=1e-6)

    print("KERNEL_OK")
</pallas_src>

<mosaic_0001>
module attributes {stable_mosaic.version = 11 : i64} {
  func.func @_mse_partial_kernel(%arg0: i32, %arg1: i32, %arg2: memref<16x128xf32, #tpu.memory_space<vmem>>, %arg3: memref<16x128xf32, #tpu.memory_space<vmem>>, %arg4: memref<1x1x128xf32, #tpu.memory_space<vmem>>, %arg5: memref<16x128xf32, #tpu.memory_space<vmem>>) attributes {dimension_semantics = [#tpu.dimension_semantics<parallel>, #tpu.dimension_semantics<arbitrary>], iteration_bounds = array<i64: 1, 1>, scalar_prefetch = 0 : i64, scratch_operands = 1 : i64, tpu.core_type = #tpu.core_type<tc>, window_params = [{transform_indices = @transform_0, window_bounds = array<i64: 16, 128>}, {transform_indices = @transform_1, window_bounds = array<i64: 16, 128>}, {transform_indices = @transform_2, window_bounds = array<i64: 1, 1, 128>}]} {
    %c0_i32 = arith.constant 0 : i32
    %0 = arith.cmpi eq, %arg1, %c0_i32 : i32
    %1 = arith.extui %0 : i1 to i32
    %c0_i32_0 = arith.constant 0 : i32
    %2 = arith.cmpi ne, %1, %c0_i32_0 : i32
    scf.if %2 {
      %cst = arith.constant 0.000000e+00 : f32
      %13 = vector.broadcast %cst : f32 to vector<16x128xf32>
      %c0_10 = arith.constant 0 : index
      %c0_11 = arith.constant 0 : index
      %14 = vector.load %arg5[%c0_10, %c0_11] : memref<16x128xf32, #tpu.memory_space<vmem>>, vector<16x128xf32>
      tpu.vector_store %arg5[%c0_10, %c0_11], %13 {strides = array<i32>} : memref<16x128xf32, #tpu.memory_space<vmem>>, vector<16x128xf32>,
    } else {
    }
    %c0 = arith.constant 0 : index
    %c0_1 = arith.constant 0 : index
    %3 = vector.load %arg2[%c0, %c0_1] : memref<16x128xf32, #tpu.memory_space<vmem>>, vector<16x128xf32>
    %c0_2 = arith.constant 0 : index
    %c0_3 = arith.constant 0 : index
    %4 = vector.load %arg3[%c0_2, %c0_3] : memref<16x128xf32, #tpu.memory_space<vmem>>, vector<16x128xf32>
    %5 = arith.subf %3, %4 : vector<16x128xf32>
    %6 = arith.mulf %5, %5 : vector<16x128xf32>
    %c0_4 = arith.constant 0 : index
    %c0_5 = arith.constant 0 : index
    %7 = vector.load %arg5[%c0_4, %c0_5] : memref<16x128xf32, #tpu.memory_space<vmem>>, vector<16x128xf32>
    %8 = arith.addf %7, %6 : vector<16x128xf32>
    %c0_6 = arith.constant 0 : index
    %c0_7 = arith.constant 0 : index
    %9 = vector.load %arg5[%c0_6, %c0_7] : memref<16x128xf32, #tpu.memory_space<vmem>>, vector<16x128xf32>
    tpu.vector_store %arg5[%c0_6, %c0_7], %8 {strides = array<i32>} : memref<16x128xf32, #tpu.memory_space<vmem>>, vector<16x128xf32>,
    %c0_i32_8 = arith.constant 0 : i32
    %10 = arith.cmpi eq, %arg1, %c0_i32_8 : i32
    %11 = arith.extui %10 : i1 to i32
    %c0_i32_9 = arith.constant 0 : i32
    %12 = arith.cmpi ne, %11, %c0_i32_9 : i32
    scf.if %12 {
      %c0_10 = arith.constant 0 : index
      %c0_11 = arith.constant 0 : index
      %13 = vector.load %arg5[%c0_10, %c0_11] : memref<16x128xf32, #tpu.memory_space<vmem>>, vector<16x128xf32>
      %cst = arith.constant dense<0.000000e+00> : vector<128xf32>
      %14 = vector.multi_reduction <add>, %13, %cst [0] : vector<16x128xf32> to vector<128xf32>
      %15 = vector.shape_cast %14 : vector<128xf32> to vector<1x128xf32>
      %c0_12 = arith.constant 0 : index
      %c0_13 = arith.constant 0 : index
      %c0_14 = arith.constant 0 : index
      %16 = vector.load %arg4[%c0_12, %c0_13, %c0_14] : memref<1x1x128xf32, #tpu.memory_space<vmem>>, vector<1x1x128xf32>
      %17 = vector.shape_cast %16 : vector<1x1x128xf32> to vector<1x128xf32>
      %18 = vector.shape_cast %15 : vector<1x128xf32> to vector<1x1x128xf32>
      tpu.vector_store %arg4[%c0_12, %c0_13, %c0_14], %18 {strides = array<i32>} : memref<1x1x128xf32, #tpu.memory_space<vmem>>, vector<1x1x128xf32>,
    } else {
    }
    return
  }
  func.func @transform_0(%arg0: i32, %arg1: i32) -> (i32, i32) {
    %c1_i32 = arith.constant 1 : i32
    %0 = arith.muli %arg0, %c1_i32 : i32
    %1 = arith.addi %0, %arg1 : i32
    %c0_i32 = arith.constant 0 : i32
    %2 = arith.minsi %1, %c0_i32 : i32
    %c0_i32_0 = arith.constant 0 : i32
    %c0_i32_1 = arith.constant 0 : i32
    return %2, %c0_i32_0 : i32, i32
  }
  func.func @transform_1(%arg0: i32, %arg1: i32) -> (i32, i32) {
    %c1_i32 = arith.constant 1 : i32
    %0 = arith.muli %arg0, %c1_i32 : i32
    %1 = arith.addi %0, %arg1 : i32
    %c0_i32 = arith.constant 0 : i32
    %2 = arith.minsi %1, %c0_i32 : i32
    %c0_i32_0 = arith.constant 0 : i32
    %c0_i32_1 = arith.constant 0 : i32
    return %2, %c0_i32_0 : i32, i32
  }
  func.func @transform_2(%arg0: i32, %arg1: i32) -> (i32, i32, i32) {
    %c0_i32 = arith.constant 0 : i32
    %c0_i32_0 = arith.constant 0 : i32
    %c0_i32_1 = arith.constant 0 : i32
    return %arg0, %c0_i32, %c0_i32_0 : i32, i32, i32
  }
}

</mosaic_0001>

<bundles_post_ra>
// kernel: tpu_custom_call.1
= control target key start
LH: loop header
LB: loop body
LE: loop exit
PB: predicated region body
PF: predicated region fallthrough
CT: control target
= control target key end

     0   :  { %7 = vsyncpa [#allocation4], 0  ;;  %s246_s0 = inlined_call_operand.hbm [shape: f32[16,128], index: 0, kind: input, shape index: {}]   ;;  %s247_s1 = inlined_call_operand.hbm [shape: f32[16,128], index: 1, kind: input, shape index: {}]   ;;  %s248_s2 = inlined_call_operand.hbm [shape: f32[1,1,128], index: 2, kind: output, shape index: {}]  }
   0x1   :  { %8 = vsyncpa [#allocation7], 0 }
   0x2   :  { %9 = vsyncpa [#allocation5], 0  ;;  %s190_s9 = smov [#allocation3]   ;;  %s118_s13 = scalar_lea.hbm %s246_s0, 256 }
   0x3   :  { %s21_s10 = sshll.u32 %s190_s9, 4  ;;  %p119_p0 = scmp.ne.s32.totalorder %s246_s0, %s118_s13  ;;  %s22_s10 = int_to_ptr.vmem [resolvable:$true] %s21_s10 }
   0x4   :  { %p122_p1 = scmp.lt.u32.totalorder %s118_s13, %s246_s0 }
   0x6   :  { %p124_p2 = pnand %p122_p1, %p119_p0 }
   0x8   :  { %127 = shalt.err (!%p124_p2)
}
   0x9   :  { %s128_s18 = scalar_lea.vmem %s22_s10, 256  ;;  %p133_p4 = scmp.lt.s32.totalorder %s22_s10, %s22_s10 }
   0xa   :  { %p129_p3 = scmp.ne.s32.totalorder %s22_s10, %s128_s18  ;;  %p134_p5 = scmp.lt.s32.totalorder %s128_s18, %s128_s18 }
   0xc   :  { %p135_p6 = por %p134_p5, %p133_p4 }
   0xe   :  { %p136_p7 = pnand %p135_p6, %p129_p3 }
  0x10   :  { %139 = shalt.err (!%p136_p7)
}
  0x11   :  { %s191_s19 = smov 128   ;;  %s192_s20 = smov 8  }
  0x12   :  { %27 = dma.hbm_to_vmem [thread:$0]  %s246_s0, 256, %s22_s10, [#allocation4], %s191_s19, %s191_s19, %s192_s20  }
  0x13   :  { %s193_s23 = smov [#allocation6]   ;;  %s140_s27 = scalar_lea.hbm %s247_s1, 256 }
  0x14   :  { %s39_s24 = sshll.u32 %s193_s23, 4  ;;  %p141_p8 = scmp.ne.s32.totalorder %s247_s1, %s140_s27  ;;  %s40_s24 = int_to_ptr.vmem [resolvable:$true] %s39_s24 }
  0x15   :  { %p144_p9 = scmp.lt.u32.totalorder %s140_s27, %s247_s1 }
  0x17   :  { %p146_p10 = pnand %p144_p9, %p141_p8 }
  0x19   :  { %149 = shalt.err (!%p146_p10)
}
  0x1a   :  { %s150_s4 = scalar_lea.vmem %s40_s24, 256  ;;  %p155_p12 = scmp.lt.s32.totalorder %s40_s24, %s40_s24 }
  0x1b   :  { %p151_p11 = scmp.ne.s32.totalorder %s40_s24, %s150_s4  ;;  %p156_p13 = scmp.lt.s32.totalorder %s150_s4, %s150_s4 }
  0x1d   :  { %p157_p0 = por %p156_p13, %p155_p12 }
  0x1f   :  { %p158_p1 = pnand %p157_p0, %p151_p11 }
  0x21   :  { %161 = shalt.err (!%p158_p1)
}
  0x22   :  { %45 = dma.hbm_to_vmem [thread:$0]  %s247_s1, 256, %s40_s24, [#allocation7], %s191_s19, %s191_s19, %s192_s20  }
  0x23   :  { %184 = dma.done.wait [#allocation4], 256  }
  0x24   :  { %185 = vsyncadd [#allocation4], 4294967040 }
  0x25   :  { %186 = dma.done.wait [#allocation7], 256  }
  0x26   :  { %187 = vsyncadd [#allocation7], 4294967040  ;;  %v66_v0 = vld [vmem:[#allocation3] sm:$0xff]  ;;  %v67_v1 = vld [vmem:[#allocation3 + $0x8] sm:$0xff]  ;;  %s194_s6 = smov [#allocation8]  }
  0x27   :  { %v68_v2 = vld [vmem:[#allocation6] sm:$0xff]  ;;  %v69_v3 = vld [vmem:[#allocation6 + $0x8] sm:$0xff]  ;;  %s99_s7 = sshll.u32 %s194_s6, 4  ;;  %s100_s7 = int_to_ptr.vmem [resolvable:$true] %s99_s7 }
  0x28   :  { %v70_v4 = vsub.f32 %v66_v0, %v68_v2  ;;  %v71_v5 = vsub.f32 %v67_v1, %v69_v3  ;;  %s162_s1 = scalar_lea.vmem %s100_s7, 16  ;;  %s166_s8 = scalar_lea.vmem %s100_s7, 32 }
  0x29   :  { %p163_p2 = scmp.ne.s32.totalorder %s100_s7, %s162_s1  ;;  %p167_p3 = scmp.lt.s32.totalorder %s100_s7, %s100_s7 }
  0x2a   :  { %v72_v6 = vmul.f32 %v70_v4, %v70_v4  ;;  %v73_v7 = vmul.f32 %v71_v5, %v71_v5  ;;  %p168_p4 = scmp.lt.s32.totalorder %s166_s8, %s162_s1 }
  0x2c   :  { %v85_v8 = vadd.f32 %v73_v7, %v72_v6  ;;  %p169_p5 = por %p168_p4, %p167_p3 }
  0x2e   :  { %v86_v9 = vrot.slane %v85_v8, 4  ;;  %p170_p6 = pnand %p169_p5, %p163_p2 }
  0x30   :  { %v87_v10 = vadd.f32 %v86_v9, %v85_v8 }
  0x32   :  { %v88_v11 = vrot.slane %v87_v10, 2 }
  0x34   :  { %v89_v12 = vadd.f32 %v88_v11, %v87_v10 }
  0x36   :  { %v90_v13 = vrot.slane %v89_v12, 1 }
  0x38   :  { %v91_v14 = vadd.f32 %v90_v13, %v89_v12 }
  0x3a   :  { %92 = vst [vmem:[#allocation8] sm:$0x1] %v91_v14 }
  0x3b   :  { %173 = shalt.err (!%p170_p6)
}
  0x3c   :  { %s174_s11 = scalar_lea.hbm %s248_s2, 16 }
  0x3d   :  { %p175_p7 = scmp.ne.s32.totalorder %s248_s2, %s174_s11  ;;  %p178_p8 = scmp.lt.u32.totalorder %s174_s11, %s248_s2 }
  0x3f   :  { %p180_p9 = pnand %p178_p8, %p175_p7 }
  0x41   :  { %183 = shalt.err (!%p180_p9)
}
  0x42   :  { %102 = dma.vmem_to_hbm [thread:$0]  %s100_s7, 16, %s248_s2, [#allocation5]  }
  0x43   :  { %188 = dma.done.wait [#allocation5], 16  }
  0x44   :  { %189 = vsyncadd [#allocation5], 4294967280 }
  0x45   :  { %106 = vsyncpa [#allocation4], 1 }
  0x46   :  { %107 = vsyncpa [#allocation7], 1 }
  0x47   :  { %108 = vsyncpa [#allocation5], 1 }

</bundles_post_ra>
